<compile_context>
chip_gen: v6e
topology: v6e:2x2x1
jax: 0.10.0
libtpu: 0.0.40
codegen_flags: <defaults>
</compile_context>

<pallas_src>
import functools

import jax
import jax.numpy as jnp
from jax import lax
from jax.experimental import pallas as pl
from jax.experimental.pallas import tpu as pltpu


# ----------------------------- fused Pallas kernel ---------------------------

def _fused_forward_kernel(x_ref, adj_ref, *refs,
                          enc_n, n_sage, dec_n, use_bn, eps, mdt,
                          batch, n_nodes):
    """Whole GraphSAGE forward on VMEM-resident tensors.

    Ref order (after x_ref, adj_ref):
      enc_n  x (W, b)        encoder linears           (W already in mdt)
      n_sage x (Wcat, b)     SAGE layers, Wcat = concat([W_l; W_r], axis=0)
      (n_sage-1) x (g, beta) BatchNorm params (only if use_bn)
      dec_n  x (W, b)        decoder linears
      o_ref                  output (B*N, dec_out)
    """
    it = iter(refs)
    enc = [(next(it), next(it)) for _ in range(enc_n)]
    sage = [(next(it), next(it)) for _ in range(n_sage)]
    bn = [(next(it), next(it)) for _ in range(n_sage - 1)] if use_bn else []
    dec = [(next(it), next(it)) for _ in range(dec_n)]
    o_ref = next(it)

    adj_m = adj_ref[...]                             # (N, N), already mdt

    z = x_ref[...]                                   # (B*N, F_in), f32

    # ---- encoder MLP (pointwise; ReLU between layers, none at the end) ----
    for li, (w_r, b_r) in enumerate(enc):
        z = jnp.dot(z.astype(mdt), w_r[...],
                    preferred_element_type=jnp.float32) + b_r[...]
        if li < enc_n - 1:
            z = jnp.maximum(z, 0.0)

    # ---- SAGEConv stack: in_layer, hidden layers, out_layer ----
    for li, (w_r, b_r) in enumerate(sage):
        zc = z.astype(mdt)
        # per-batch mean aggregation with the shared adjacency (static unroll,
        # slices land on sublane multiples since N % 8 == 0 at these shapes)
        aggs = [jnp.dot(adj_m, zc[b * n_nodes:(b + 1) * n_nodes, :],
                        preferred_element_type=jnp.float32).astype(mdt)
                for b in range(batch)]
        agg = jnp.concatenate(aggs, axis=0) if batch > 1 else aggs[0]
        # merged projection: [agg, x] @ [W_l; W_r] + b  (single MXU push)
        h = jnp.concatenate([agg, zc], axis=-1)
        z = jnp.dot(h, w_r[...],
                    preferred_element_type=jnp.float32) + b_r[...]
        if li < n_sage - 1:                          # all but out_layer
            if use_bn:
                g_r, be_r = bn[li]
                mean = jnp.mean(z, axis=0, keepdims=True)
                var = jnp.mean((z - mean) ** 2, axis=0, keepdims=True)  # biased
                z = (z - mean) * lax.rsqrt(var + eps) * g_r[...] + be_r[...]
            z = jnp.maximum(z, 0.0)

    # ---- decoder MLP ----
    for li, (w_r, b_r) in enumerate(dec):
        z = jnp.dot(z.astype(mdt), w_r[...],
                    preferred_element_type=jnp.float32) + b_r[...]
        if li < dec_n - 1:
            z = jnp.maximum(z, 0.0)

    o_ref[...] = z


# ------------------------------ JAX glue --------------------------------------

def edge_index_to_norm_adj(edge_index, num_nodes):
    """Dense row-normalized adjacency: A[i, j] = (#edges j->i) / deg_in(i)."""
    src, dst = edge_index[0], edge_index[1]
    a = jnp.zeros((num_nodes, num_nodes), jnp.float32).at[dst, src].add(1.0)
    deg = a.sum(axis=1, keepdims=True)
    return jnp.where(deg > 0, a / jnp.maximum(deg, 1.0), 0.0)


def init_params(key, hparams):
    enc_dims = hparams["encoder"]
    dec_dims = hparams["decoder"]
    hid = hparams["size_hidden_layers"]
    nb = hparams["nb_hidden_layers"]

    def dense(key, cin, cout):
        k1, k2 = jax.random.split(key)
        scale = 1.0 / jnp.sqrt(jnp.float32(cin))
        return (jax.random.uniform(k1, (cin, cout), jnp.float32, -scale, scale),
                jax.random.uniform(k2, (cout,), jnp.float32, -scale, scale))

    def sage(key, cin, cout):
        k1, k2, k3 = jax.random.split(key, 3)
        scale = 1.0 / jnp.sqrt(jnp.float32(cin))
        wl = jax.random.uniform(k1, (cin, cout), jnp.float32, -scale, scale)
        wr = jax.random.uniform(k2, (cin, cout), jnp.float32, -scale, scale)
        b = jax.random.uniform(k3, (cout,), jnp.float32, -scale, scale)
        return (wl, wr, b)

    keys = jax.random.split(key, 64)
    ki = iter(range(64))

    params = {}
    params["encoder"] = [dense(keys[next(ki)], enc_dims[i], enc_dims[i + 1])
                         for i in range(len(enc_dims) - 1)]
    params["in_layer"] = sage(keys[next(ki)], enc_dims[-1], hid)
    params["hidden"] = [sage(keys[next(ki)], hid, hid) for _ in range(nb - 1)]
    params["out_layer"] = sage(keys[next(ki)], hid, dec_dims[0])
    params["bn"] = [(jnp.ones((hid,), jnp.float32), jnp.zeros((hid,), jnp.float32))
                    for _ in range(nb)]
    params["decoder"] = [dense(keys[next(ki)], dec_dims[i], dec_dims[i + 1])
                         for i in range(len(dec_dims) - 1)]
    return params


def graphsage_forward(params, x, adj, hparams, matmul_dtype=jnp.bfloat16):
    """Fused forward pass. x: (B, N, F_in); adj: (N, N) row-normalized."""
    B, N, F_in = x.shape
    use_bn = bool(hparams.get("bn_bool", True))
    dec_out = hparams["decoder"][-1]

    enc = params["encoder"]
    sage_layers = [params["in_layer"]] + list(params["hidden"]) + [params["out_layer"]]
    dec = params["decoder"]
    n_sage = len(sage_layers)

    flat = []
    for (w, b) in enc:
        flat += [w.astype(matmul_dtype), b.reshape(1, -1)]
    for (wl, wr, b) in sage_layers:
        # merge the two SAGE projection matrices into one (2*Cin, Cout) matmul
        flat += [jnp.concatenate([wl, wr], axis=0).astype(matmul_dtype),
                 b.reshape(1, -1)]
    if use_bn:
        for (g, be) in params["bn"]:
            flat += [g.reshape(1, -1), be.reshape(1, -1)]
    for (w, b) in dec:
        flat += [w.astype(matmul_dtype), b.reshape(1, -1)]

    x2 = x.reshape(B * N, F_in)
    adj_m = adj.astype(matmul_dtype)
    args = [x2, adj_m] + flat

    def full_spec(a):
        nd = a.ndim
        return pl.BlockSpec(a.shape, lambda i, nd=nd: (0,) * nd)

    kernel = functools.partial(
        _fused_forward_kernel,
        enc_n=len(enc), n_sage=n_sage, dec_n=len(dec),
        use_bn=use_bn, eps=1e-5, mdt=matmul_dtype,
        batch=B, n_nodes=N)

    out2 = pl.pallas_call(
        kernel,
        out_shape=jax.ShapeDtypeStruct((B * N, dec_out), jnp.float32),
        grid=(1,),
        in_specs=[full_spec(a) for a in args],
        out_specs=pl.BlockSpec((B * N, dec_out), lambda i: (0, 0)),
        compiler_params=pltpu.CompilerParams(
            dimension_semantics=("arbitrary",)),
    )(*args)
    return out2.reshape(B, N, dec_out)


# ------------------------------- main ----------------------------------------

if __name__ == "__main__":
    hparams = {
        "nb_hidden_layers": 3,
        "size_hidden_layers": 32,
        "bn_bool": True,
        "encoder": [8, 16, 8],   # encoder[-1] = SAGE in_channels
        "decoder": [32, 16, 4],  # decoder[0]  = SAGE out_channels
    }

    B, N, E = 2, 16, 48
    F_in = hparams["encoder"][0]

    key = jax.random.PRNGKey(0)
    kx, ke, kp = jax.random.split(key, 3)

    x = jax.random.normal(kx, (B, N, F_in), jnp.float32)
    edge_index = jax.random.randint(ke, (2, E), 0, N, jnp.int32)
    adj = edge_index_to_norm_adj(edge_index, N)

    params = init_params(kp, hparams)

    out = graphsage_forward(params, x, adj, hparams)
    out = jax.block_until_ready(out)
    assert out.shape == (B, N, hparams["decoder"][-1])
    assert jnp.all(jnp.isfinite(out))
    print("KERNEL_OK")
</pallas_src>

<mosaic_0001>
module attributes {stable_mosaic.version = 11 : i64} {
  func.func @_fused_forward_kernel(%arg0: i32, %arg1: memref<32x8xf32, #tpu.memory_space<vmem>>, %arg2: memref<16x16xbf16, #tpu.memory_space<vmem>>, %arg3: memref<8x16xbf16, #tpu.memory_space<vmem>>, %arg4: memref<1x16xf32, #tpu.memory_space<vmem>>, %arg5: memref<16x8xbf16, #tpu.memory_space<vmem>>, %arg6: memref<1x8xf32, #tpu.memory_space<vmem>>, %arg7: memref<16x32xbf16, #tpu.memory_space<vmem>>, %arg8: memref<1x32xf32, #tpu.memory_space<vmem>>, %arg9: memref<64x32xbf16, #tpu.memory_space<vmem>>, %arg10: memref<1x32xf32, #tpu.memory_space<vmem>>, %arg11: memref<64x32xbf16, #tpu.memory_space<vmem>>, %arg12: memref<1x32xf32, #tpu.memory_space<vmem>>, %arg13: memref<64x32xbf16, #tpu.memory_space<vmem>>, %arg14: memref<1x32xf32, #tpu.memory_space<vmem>>, %arg15: memref<1x32xf32, #tpu.memory_space<vmem>>, %arg16: memref<1x32xf32, #tpu.memory_space<vmem>>, %arg17: memref<1x32xf32, #tpu.memory_space<vmem>>, %arg18: memref<1x32xf32, #tpu.memory_space<vmem>>, %arg19: memref<1x32xf32, #tpu.memory_space<vmem>>, %arg20: memref<1x32xf32, #tpu.memory_space<vmem>>, %arg21: memref<32x16xbf16, #tpu.memory_space<vmem>>, %arg22: memref<1x16xf32, #tpu.memory_space<vmem>>, %arg23: memref<16x4xbf16, #tpu.memory_space<vmem>>, %arg24: memref<1x4xf32, #tpu.memory_space<vmem>>, %arg25: memref<32x4xf32, #tpu.memory_space<vmem>>) attributes {dimension_semantics = [#tpu.dimension_semantics<arbitrary>], iteration_bounds = array<i64: 1>, scalar_prefetch = 0 : i64, scratch_operands = 0 : i64, tpu.core_type = #tpu.core_type<tc>, window_params = [{pipeline_mode = #tpu.pipeline_mode<synchronous>, transform_indices = @transform_0, window_bounds = array<i64: 32, 8>}, {pipeline_mode = #tpu.pipeline_mode<synchronous>, transform_indices = @transform_1, window_bounds = array<i64: 16, 16>}, {pipeline_mode = #tpu.pipeline_mode<synchronous>, transform_indices = @transform_2, window_bounds = array<i64: 8, 16>}, {pipeline_mode = #tpu.pipeline_mode<synchronous>, transform_indices = @transform_3, window_bounds = array<i64: 1, 16>}, {pipeline_mode = #tpu.pipeline_mode<synchronous>, transform_indices = @transform_4, window_bounds = array<i64: 16, 8>}, {pipeline_mode = #tpu.pipeline_mode<synchronous>, transform_indices = @transform_5, window_bounds = array<i64: 1, 8>}, {pipeline_mode = #tpu.pipeline_mode<synchronous>, transform_indices = @transform_6, window_bounds = array<i64: 16, 32>}, {pipeline_mode = #tpu.pipeline_mode<synchronous>, transform_indices = @transform_7, window_bounds = array<i64: 1, 32>}, {pipeline_mode = #tpu.pipeline_mode<synchronous>, transform_indices = @transform_8, window_bounds = array<i64: 64, 32>}, {pipeline_mode = #tpu.pipeline_mode<synchronous>, transform_indices = @transform_9, window_bounds = array<i64: 1, 32>}, {pipeline_mode = #tpu.pipeline_mode<synchronous>, transform_indices = @transform_10, window_bounds = array<i64: 64, 32>}, {pipeline_mode = #tpu.pipeline_mode<synchronous>, transform_indices = @transform_11, window_bounds = array<i64: 1, 32>}, {pipeline_mode = #tpu.pipeline_mode<synchronous>, transform_indices = @transform_12, window_bounds = array<i64: 64, 32>}, {pipeline_mode = #tpu.pipeline_mode<synchronous>, transform_indices = @transform_13, window_bounds = array<i64: 1, 32>}, {pipeline_mode = #tpu.pipeline_mode<synchronous>, transform_indices = @transform_14, window_bounds = array<i64: 1, 32>}, {pipeline_mode = #tpu.pipeline_mode<synchronous>, transform_indices = @transform_15, window_bounds = array<i64: 1, 32>}, {pipeline_mode = #tpu.pipeline_mode<synchronous>, transform_indices = @transform_16, window_bounds = array<i64: 1, 32>}, {pipeline_mode = #tpu.pipeline_mode<synchronous>, transform_indices = @transform_17, window_bounds = array<i64: 1, 32>}, {pipeline_mode = #tpu.pipeline_mode<synchronous>, transform_indices = @transform_18, window_bounds = array<i64: 1, 32>}, {pipeline_mode = #tpu.pipeline_mode<synchronous>, transform_indices = @transform_19, window_bounds = array<i64: 1, 32>}, {pipeline_mode = #tpu.pipeline_mode<synchronous>, transform_indices = @transform_20, window_bounds = array<i64: 32, 16>}, {pipeline_mode = #tpu.pipeline_mode<synchronous>, transform_indices = @transform_21, window_bounds = array<i64: 1, 16>}, {pipeline_mode = #tpu.pipeline_mode<synchronous>, transform_indices = @transform_22, window_bounds = array<i64: 16, 4>}, {pipeline_mode = #tpu.pipeline_mode<synchronous>, transform_indices = @transform_23, window_bounds = array<i64: 1, 4>}, {pipeline_mode = #tpu.pipeline_mode<synchronous>, transform_indices = @transform_24, window_bounds = array<i64: 32, 4>}]} {
    %c0 = arith.constant 0 : index
    %c0_0 = arith.constant 0 : index
    %0 = vector.load %arg2[%c0, %c0_0] : memref<16x16xbf16, #tpu.memory_space<vmem>>, vector<16x16xbf16>
    %c0_1 = arith.constant 0 : index
    %c0_2 = arith.constant 0 : index
    %1 = vector.load %arg1[%c0_1, %c0_2] : memref<32x8xf32, #tpu.memory_space<vmem>>, vector<32x8xf32>
    %2 = arith.truncf %1 : vector<32x8xf32> to vector<32x8xbf16>
    %c0_3 = arith.constant 0 : index
    %c0_4 = arith.constant 0 : index
    %3 = vector.load %arg3[%c0_3, %c0_4] : memref<8x16xbf16, #tpu.memory_space<vmem>>, vector<8x16xbf16>
    %cst = arith.constant dense<0.000000e+00> : vector<32x16xf32>
    %4 = tpu.matmul %2, %3, %cst {dimension_numbers = #tpu.dot_dimension_numbers<[1], [0], [0], [1], [0, 0, 1, 1], [], []>} : vector<32x8xbf16>, vector<8x16xbf16>, vector<32x16xf32> -> vector<32x16xf32>
    %c0_5 = arith.constant 0 : index
    %c0_6 = arith.constant 0 : index
    %5 = vector.load %arg4[%c0_5, %c0_6] : memref<1x16xf32, #tpu.memory_space<vmem>>, vector<1x16xf32>
    %6 = vector.broadcast %5 : vector<1x16xf32> to vector<32x16xf32>
    %7 = arith.addf %4, %6 : vector<32x16xf32>
    %cst_7 = arith.constant 0.000000e+00 : f32
    %8 = vector.broadcast %cst_7 : f32 to vector<32x16xf32>
    %9 = arith.maximumf %7, %8 : vector<32x16xf32>
    %10 = arith.truncf %9 : vector<32x16xf32> to vector<32x16xbf16>
    %c0_8 = arith.constant 0 : index
    %c0_9 = arith.constant 0 : index
    %11 = vector.load %arg5[%c0_8, %c0_9] : memref<16x8xbf16, #tpu.memory_space<vmem>>, vector<16x8xbf16>
    %cst_10 = arith.constant dense<0.000000e+00> : vector<32x8xf32>
    %12 = tpu.matmul %10, %11, %cst_10 {dimension_numbers = #tpu.dot_dimension_numbers<[1], [0], [0], [1], [0, 0, 1, 1], [], []>} : vector<32x16xbf16>, vector<16x8xbf16>, vector<32x8xf32> -> vector<32x8xf32>
    %c0_11 = arith.constant 0 : index
    %c0_12 = arith.constant 0 : index
    %13 = vector.load %arg6[%c0_11, %c0_12] : memref<1x8xf32, #tpu.memory_space<vmem>>, vector<1x8xf32>
    %14 = vector.broadcast %13 : vector<1x8xf32> to vector<32x8xf32>
    %15 = arith.addf %12, %14 : vector<32x8xf32>
    %16 = arith.truncf %15 : vector<32x8xf32> to vector<32x8xbf16>
    %17 = vector.extract_strided_slice %16 {offsets = [0, 0], sizes = [16, 8], strides = [1, 1]} : vector<32x8xbf16> to vector<16x8xbf16>
    %cst_13 = arith.constant dense<0.000000e+00> : vector<16x8xf32>
    %18 = tpu.matmul %0, %17, %cst_13 {dimension_numbers = #tpu.dot_dimension_numbers<[1], [0], [0], [1], [0, 0, 1, 1], [], []>} : vector<16x16xbf16>, vector<16x8xbf16>, vector<16x8xf32> -> vector<16x8xf32>
    %19 = arith.truncf %18 : vector<16x8xf32> to vector<16x8xbf16>
    %20 = vector.extract_strided_slice %16 {offsets = [16, 0], sizes = [16, 8], strides = [1, 1]} : vector<32x8xbf16> to vector<16x8xbf16>
    %cst_14 = arith.constant dense<0.000000e+00> : vector<16x8xf32>
    %21 = tpu.matmul %0, %20, %cst_14 {dimension_numbers = #tpu.dot_dimension_numbers<[1], [0], [0], [1], [0, 0, 1, 1], [], []>} : vector<16x16xbf16>, vector<16x8xbf16>, vector<16x8xf32> -> vector<16x8xf32>
    %22 = arith.truncf %21 : vector<16x8xf32> to vector<16x8xbf16>
    %23 = tpu.concatenate %19, %22 in 0 : vector<16x8xbf16>, vector<16x8xbf16> -> vector<32x8xbf16>
    %24 = tpu.concatenate %23, %16 in 1 : vector<32x8xbf16>, vector<32x8xbf16> -> vector<32x16xbf16>
    %c0_15 = arith.constant 0 : index
    %c0_16 = arith.constant 0 : index
    %25 = vector.load %arg7[%c0_15, %c0_16] : memref<16x32xbf16, #tpu.memory_space<vmem>>, vector<16x32xbf16>
    %cst_17 = arith.constant dense<0.000000e+00> : vector<32x32xf32>
    %26 = tpu.matmul %24, %25, %cst_17 {dimension_numbers = #tpu.dot_dimension_numbers<[1], [0], [0], [1], [0, 0, 1, 1], [], []>} : vector<32x16xbf16>, vector<16x32xbf16>, vector<32x32xf32> -> vector<32x32xf32>
    %c0_18 = arith.constant 0 : index
    %c0_19 = arith.constant 0 : index
    %27 = vector.load %arg8[%c0_18, %c0_19] : memref<1x32xf32, #tpu.memory_space<vmem>>, vector<1x32xf32>
    %28 = vector.broadcast %27 : vector<1x32xf32> to vector<32x32xf32>
    %29 = arith.addf %26, %28 : vector<32x32xf32>
    %cst_20 = arith.constant dense<0.000000e+00> : vector<32xf32>
    %30 = vector.multi_reduction <add>, %29, %cst_20 [0] : vector<32x32xf32> to vector<32xf32>
    %31 = vector.shape_cast %30 : vector<32xf32> to vector<1x32xf32>
    %cst_21 = arith.constant 3.200000e+01 : f32
    %32 = vector.broadcast %cst_21 : f32 to vector<1x32xf32>
    %33 = arith.divf %31, %32 : vector<1x32xf32>
    %34 = vector.broadcast %33 : vector<1x32xf32> to vector<32x32xf32>
    %35 = arith.subf %29, %34 : vector<32x32xf32>
    %36 = arith.mulf %35, %35 : vector<32x32xf32>
    %cst_22 = arith.constant dense<0.000000e+00> : vector<32xf32>
    %37 = vector.multi_reduction <add>, %36, %cst_22 [0] : vector<32x32xf32> to vector<32xf32>
    %38 = vector.shape_cast %37 : vector<32xf32> to vector<1x32xf32>
    %cst_23 = arith.constant 3.200000e+01 : f32
    %39 = vector.broadcast %cst_23 : f32 to vector<1x32xf32>
    %40 = arith.divf %38, %39 : vector<1x32xf32>
    %41 = vector.broadcast %33 : vector<1x32xf32> to vector<32x32xf32>
    %42 = arith.subf %29, %41 : vector<32x32xf32>
    %cst_24 = arith.constant 9.99999974E-6 : f32
    %43 = vector.broadcast %cst_24 : f32 to vector<1x32xf32>
    %44 = arith.addf %40, %43 : vector<1x32xf32>
    %45 = math.rsqrt %44 : vector<1x32xf32>
    %46 = vector.broadcast %45 : vector<1x32xf32> to vector<32x32xf32>
    %47 = arith.mulf %42, %46 : vector<32x32xf32>
    %c0_25 = arith.constant 0 : index
    %c0_26 = arith.constant 0 : index
    %48 = vector.load %arg15[%c0_25, %c0_26] : memref<1x32xf32, #tpu.memory_space<vmem>>, vector<1x32xf32>
    %49 = vector.broadcast %48 : vector<1x32xf32> to vector<32x32xf32>
    %50 = arith.mulf %47, %49 : vector<32x32xf32>
    %c0_27 = arith.constant 0 : index
    %c0_28 = arith.constant 0 : index
    %51 = vector.load %arg16[%c0_27, %c0_28] : memref<1x32xf32, #tpu.memory_space<vmem>>, vector<1x32xf32>
    %52 = vector.broadcast %51 : vector<1x32xf32> to vector<32x32xf32>
    %53 = arith.addf %50, %52 : vector<32x32xf32>
    %cst_29 = arith.constant 0.000000e+00 : f32
    %54 = vector.broadcast %cst_29 : f32 to vector<32x32xf32>
    %55 = arith.maximumf %53, %54 : vector<32x32xf32>
    %56 = arith.truncf %55 : vector<32x32xf32> to vector<32x32xbf16>
    %57 = vector.extract_strided_slice %56 {offsets = [0, 0], sizes = [16, 32], strides = [1, 1]} : vector<32x32xbf16> to vector<16x32xbf16>
    %cst_30 = arith.constant dense<0.000000e+00> : vector<16x32xf32>
    %58 = tpu.matmul %0, %57, %cst_30 {dimension_numbers = #tpu.dot_dimension_numbers<[1], [0], [0], [1], [0, 0, 1, 1], [], []>} : vector<16x16xbf16>, vector<16x32xbf16>, vector<16x32xf32> -> vector<16x32xf32>
    %59 = arith.truncf %58 : vector<16x32xf32> to vector<16x32xbf16>
    %60 = vector.extract_strided_slice %56 {offsets = [16, 0], sizes = [16, 32], strides = [1, 1]} : vector<32x32xbf16> to vector<16x32xbf16>
    %cst_31 = arith.constant dense<0.000000e+00> : vector<16x32xf32>
    %61 = tpu.matmul %0, %60, %cst_31 {dimension_numbers = #tpu.dot_dimension_numbers<[1], [0], [0], [1], [0, 0, 1, 1], [], []>} : vector<16x16xbf16>, vector<16x32xbf16>, vector<16x32xf32> -> vector<16x32xf32>
    %62 = arith.truncf %61 : vector<16x32xf32> to vector<16x32xbf16>
    %63 = tpu.concatenate %59, %62 in 0 : vector<16x32xbf16>, vector<16x32xbf16> -> vector<32x32xbf16>
    %64 = tpu.concatenate %63, %56 in 1 : vector<32x32xbf16>, vector<32x32xbf16> -> vector<32x64xbf16>
    %c0_32 = arith.constant 0 : index
    %c0_33 = arith.constant 0 : index
    %65 = vector.load %arg9[%c0_32, %c0_33] : memref<64x32xbf16, #tpu.memory_space<vmem>>, vector<64x32xbf16>
    %cst_34 = arith.constant dense<0.000000e+00> : vector<32x32xf32>
    %66 = tpu.matmul %64, %65, %cst_34 {dimension_numbers = #tpu.dot_dimension_numbers<[1], [0], [0], [1], [0, 0, 1, 1], [], []>} : vector<32x64xbf16>, vector<64x32xbf16>, vector<32x32xf32> -> vector<32x32xf32>
    %c0_35 = arith.constant 0 : index
    %c0_36 = arith.constant 0 : index
    %67 = vector.load %arg10[%c0_35, %c0_36] : memref<1x32xf32, #tpu.memory_space<vmem>>, vector<1x32xf32>
    %68 = vector.broadcast %67 : vector<1x32xf32> to vector<32x32xf32>
    %69 = arith.addf %66, %68 : vector<32x32xf32>
    %cst_37 = arith.constant dense<0.000000e+00> : vector<32xf32>
    %70 = vector.multi_reduction <add>, %69, %cst_37 [0] : vector<32x32xf32> to vector<32xf32>
    %71 = vector.shape_cast %70 : vector<32xf32> to vector<1x32xf32>
    %cst_38 = arith.constant 3.200000e+01 : f32
    %72 = vector.broadcast %cst_38 : f32 to vector<1x32xf32>
    %73 = arith.divf %71, %72 : vector<1x32xf32>
    %74 = vector.broadcast %73 : vector<1x32xf32> to vector<32x32xf32>
    %75 = arith.subf %69, %74 : vector<32x32xf32>
    %76 = arith.mulf %75, %75 : vector<32x32xf32>
    %cst_39 = arith.constant dense<0.000000e+00> : vector<32xf32>
    %77 = vector.multi_reduction <add>, %76, %cst_39 [0] : vector<32x32xf32> to vector<32xf32>
    %78 = vector.shape_cast %77 : vector<32xf32> to vector<1x32xf32>
    %cst_40 = arith.constant 3.200000e+01 : f32
    %79 = vector.broadcast %cst_40 : f32 to vector<1x32xf32>
    %80 = arith.divf %78, %79 : vector<1x32xf32>
    %81 = vector.broadcast %73 : vector<1x32xf32> to vector<32x32xf32>
    %82 = arith.subf %69, %81 : vector<32x32xf32>
    %cst_41 = arith.constant 9.99999974E-6 : f32
    %83 = vector.broadcast %cst_41 : f32 to vector<1x32xf32>
    %84 = arith.addf %80, %83 : vector<1x32xf32>
    %85 = math.rsqrt %84 : vector<1x32xf32>
    %86 = vector.broadcast %85 : vector<1x32xf32> to vector<32x32xf32>
    %87 = arith.mulf %82, %86 : vector<32x32xf32>
    %c0_42 = arith.constant 0 : index
    %c0_43 = arith.constant 0 : index
    %88 = vector.load %arg17[%c0_42, %c0_43] : memref<1x32xf32, #tpu.memory_space<vmem>>, vector<1x32xf32>
    %89 = vector.broadcast %88 : vector<1x32xf32> to vector<32x32xf32>
    %90 = arith.mulf %87, %89 : vector<32x32xf32>
    %c0_44 = arith.constant 0 : index
    %c0_45 = arith.constant 0 : index
    %91 = vector.load %arg18[%c0_44, %c0_45] : memref<1x32xf32, #tpu.memory_space<vmem>>, vector<1x32xf32>
    %92 = vector.broadcast %91 : vector<1x32xf32> to vector<32x32xf32>
    %93 = arith.addf %90, %92 : vector<32x32xf32>
    %cst_46 = arith.constant 0.000000e+00 : f32
    %94 = vector.broadcast %cst_46 : f32 to vector<32x32xf32>
    %95 = arith.maximumf %93, %94 : vector<32x32xf32>
    %96 = arith.truncf %95 : vector<32x32xf32> to vector<32x32xbf16>
    %97 = vector.extract_strided_slice %96 {offsets = [0, 0], sizes = [16, 32], strides = [1, 1]} : vector<32x32xbf16> to vector<16x32xbf16>
    %cst_47 = arith.constant dense<0.000000e+00> : vector<16x32xf32>
    %98 = tpu.matmul %0, %97, %cst_47 {dimension_numbers = #tpu.dot_dimension_numbers<[1], [0], [0], [1], [0, 0, 1, 1], [], []>} : vector<16x16xbf16>, vector<16x32xbf16>, vector<16x32xf32> -> vector<16x32xf32>
    %99 = arith.truncf %98 : vector<16x32xf32> to vector<16x32xbf16>
    %100 = vector.extract_strided_slice %96 {offsets = [16, 0], sizes = [16, 32], strides = [1, 1]} : vector<32x32xbf16> to vector<16x32xbf16>
    %cst_48 = arith.constant dense<0.000000e+00> : vector<16x32xf32>
    %101 = tpu.matmul %0, %100, %cst_48 {dimension_numbers = #tpu.dot_dimension_numbers<[1], [0], [0], [1], [0, 0, 1, 1], [], []>} : vector<16x16xbf16>, vector<16x32xbf16>, vector<16x32xf32> -> vector<16x32xf32>
    %102 = arith.truncf %101 : vector<16x32xf32> to vector<16x32xbf16>
    %103 = tpu.concatenate %99, %102 in 0 : vector<16x32xbf16>, vector<16x32xbf16> -> vector<32x32xbf16>
    %104 = tpu.concatenate %103, %96 in 1 : vector<32x32xbf16>, vector<32x32xbf16> -> vector<32x64xbf16>
    %c0_49 = arith.constant 0 : index
    %c0_50 = arith.constant 0 : index
    %105 = vector.load %arg11[%c0_49, %c0_50] : memref<64x32xbf16, #tpu.memory_space<vmem>>, vector<64x32xbf16>
    %cst_51 = arith.constant dense<0.000000e+00> : vector<32x32xf32>
    %106 = tpu.matmul %104, %105, %cst_51 {dimension_numbers = #tpu.dot_dimension_numbers<[1], [0], [0], [1], [0, 0, 1, 1], [], []>} : vector<32x64xbf16>, vector<64x32xbf16>, vector<32x32xf32> -> vector<32x32xf32>
    %c0_52 = arith.constant 0 : index
    %c0_53 = arith.constant 0 : index
    %107 = vector.load %arg12[%c0_52, %c0_53] : memref<1x32xf32, #tpu.memory_space<vmem>>, vector<1x32xf32>
    %108 = vector.broadcast %107 : vector<1x32xf32> to vector<32x32xf32>
    %109 = arith.addf %106, %108 : vector<32x32xf32>
    %cst_54 = arith.constant dense<0.000000e+00> : vector<32xf32>
    %110 = vector.multi_reduction <add>, %109, %cst_54 [0] : vector<32x32xf32> to vector<32xf32>
    %111 = vector.shape_cast %110 : vector<32xf32> to vector<1x32xf32>
    %cst_55 = arith.constant 3.200000e+01 : f32
    %112 = vector.broadcast %cst_55 : f32 to vector<1x32xf32>
    %113 = arith.divf %111, %112 : vector<1x32xf32>
    %114 = vector.broadcast %113 : vector<1x32xf32> to vector<32x32xf32>
    %115 = arith.subf %109, %114 : vector<32x32xf32>
    %116 = arith.mulf %115, %115 : vector<32x32xf32>
    %cst_56 = arith.constant dense<0.000000e+00> : vector<32xf32>
    %117 = vector.multi_reduction <add>, %116, %cst_56 [0] : vector<32x32xf32> to vector<32xf32>
    %118 = vector.shape_cast %117 : vector<32xf32> to vector<1x32xf32>
    %cst_57 = arith.constant 3.200000e+01 : f32
    %119 = vector.broadcast %cst_57 : f32 to vector<1x32xf32>
    %120 = arith.divf %118, %119 : vector<1x32xf32>
    %121 = vector.broadcast %113 : vector<1x32xf32> to vector<32x32xf32>
    %122 = arith.subf %109, %121 : vector<32x32xf32>
    %cst_58 = arith.constant 9.99999974E-6 : f32
    %123 = vector.broadcast %cst_58 : f32 to vector<1x32xf32>
    %124 = arith.addf %120, %123 : vector<1x32xf32>
    %125 = math.rsqrt %124 : vector<1x32xf32>
    %126 = vector.broadcast %125 : vector<1x32xf32> to vector<32x32xf32>
    %127 = arith.mulf %122, %126 : vector<32x32xf32>
    %c0_59 = arith.constant 0 : index
    %c0_60 = arith.constant 0 : index
    %128 = vector.load %arg19[%c0_59, %c0_60] : memref<1x32xf32, #tpu.memory_space<vmem>>, vector<1x32xf32>
    %129 = vector.broadcast %128 : vector<1x32xf32> to vector<32x32xf32>
    %130 = arith.mulf %127, %129 : vector<32x32xf32>
    %c0_61 = arith.constant 0 : index
    %c0_62 = arith.constant 0 : index
    %131 = vector.load %arg20[%c0_61, %c0_62] : memref<1x32xf32, #tpu.memory_space<vmem>>, vector<1x32xf32>
    %132 = vector.broadcast %131 : vector<1x32xf32> to vector<32x32xf32>
    %133 = arith.addf %130, %132 : vector<32x32xf32>
    %cst_63 = arith.constant 0.000000e+00 : f32
    %134 = vector.broadcast %cst_63 : f32 to vector<32x32xf32>
    %135 = arith.maximumf %133, %134 : vector<32x32xf32>
    %136 = arith.truncf %135 : vector<32x32xf32> to vector<32x32xbf16>
    %137 = vector.extract_strided_slice %136 {offsets = [0, 0], sizes = [16, 32], strides = [1, 1]} : vector<32x32xbf16> to vector<16x32xbf16>
    %cst_64 = arith.constant dense<0.000000e+00> : vector<16x32xf32>
    %138 = tpu.matmul %0, %137, %cst_64 {dimension_numbers = #tpu.dot_dimension_numbers<[1], [0], [0], [1], [0, 0, 1, 1], [], []>} : vector<16x16xbf16>, vector<16x32xbf16>, vector<16x32xf32> -> vector<16x32xf32>
    %139 = arith.truncf %138 : vector<16x32xf32> to vector<16x32xbf16>
    %140 = vector.extract_strided_slice %136 {offsets = [16, 0], sizes = [16, 32], strides = [1, 1]} : vector<32x32xbf16> to vector<16x32xbf16>
    %cst_65 = arith.constant dense<0.000000e+00> : vector<16x32xf32>
    %141 = tpu.matmul %0, %140, %cst_65 {dimension_numbers = #tpu.dot_dimension_numbers<[1], [0], [0], [1], [0, 0, 1, 1], [], []>} : vector<16x16xbf16>, vector<16x32xbf16>, vector<16x32xf32> -> vector<16x32xf32>
    %142 = arith.truncf %141 : vector<16x32xf32> to vector<16x32xbf16>
    %143 = tpu.concatenate %139, %142 in 0 : vector<16x32xbf16>, vector<16x32xbf16> -> vector<32x32xbf16>
    %144 = tpu.concatenate %143, %136 in 1 : vector<32x32xbf16>, vector<32x32xbf16> -> vector<32x64xbf16>
    %c0_66 = arith.constant 0 : index
    %c0_67 = arith.constant 0 : index
    %145 = vector.load %arg13[%c0_66, %c0_67] : memref<64x32xbf16, #tpu.memory_space<vmem>>, vector<64x32xbf16>
    %cst_68 = arith.constant dense<0.000000e+00> : vector<32x32xf32>
    %146 = tpu.matmul %144, %145, %cst_68 {dimension_numbers = #tpu.dot_dimension_numbers<[1], [0], [0], [1], [0, 0, 1, 1], [], []>} : vector<32x64xbf16>, vector<64x32xbf16>, vector<32x32xf32> -> vector<32x32xf32>
    %c0_69 = arith.constant 0 : index
    %c0_70 = arith.constant 0 : index
    %147 = vector.load %arg14[%c0_69, %c0_70] : memref<1x32xf32, #tpu.memory_space<vmem>>, vector<1x32xf32>
    %148 = vector.broadcast %147 : vector<1x32xf32> to vector<32x32xf32>
    %149 = arith.addf %146, %148 : vector<32x32xf32>
    %150 = arith.truncf %149 : vector<32x32xf32> to vector<32x32xbf16>
    %c0_71 = arith.constant 0 : index
    %c0_72 = arith.constant 0 : index
    %151 = vector.load %arg21[%c0_71, %c0_72] : memref<32x16xbf16, #tpu.memory_space<vmem>>, vector<32x16xbf16>
    %cst_73 = arith.constant dense<0.000000e+00> : vector<32x16xf32>
    %152 = tpu.matmul %150, %151, %cst_73 {dimension_numbers = #tpu.dot_dimension_numbers<[1], [0], [0], [1], [0, 0, 1, 1], [], []>} : vector<32x32xbf16>, vector<32x16xbf16>, vector<32x16xf32> -> vector<32x16xf32>
    %c0_74 = arith.constant 0 : index
    %c0_75 = arith.constant 0 : index
    %153 = vector.load %arg22[%c0_74, %c0_75] : memref<1x16xf32, #tpu.memory_space<vmem>>, vector<1x16xf32>
    %154 = vector.broadcast %153 : vector<1x16xf32> to vector<32x16xf32>
    %155 = arith.addf %152, %154 : vector<32x16xf32>
    %cst_76 = arith.constant 0.000000e+00 : f32
    %156 = vector.broadcast %cst_76 : f32 to vector<32x16xf32>
    %157 = arith.maximumf %155, %156 : vector<32x16xf32>
    %158 = arith.truncf %157 : vector<32x16xf32> to vector<32x16xbf16>
    %c0_77 = arith.constant 0 : index
    %c0_78 = arith.constant 0 : index
    %159 = vector.load %arg23[%c0_77, %c0_78] : memref<16x4xbf16, #tpu.memory_space<vmem>>, vector<16x4xbf16>
    %cst_79 = arith.constant dense<0.000000e+00> : vector<32x4xf32>
    %160 = tpu.matmul %158, %159, %cst_79 {dimension_numbers = #tpu.dot_dimension_numbers<[1], [0], [0], [1], [0, 0, 1, 1], [], []>} : vector<32x16xbf16>, vector<16x4xbf16>, vector<32x4xf32> -> vector<32x4xf32>
    %c0_80 = arith.constant 0 : index
    %c0_81 = arith.constant 0 : index
    %161 = vector.load %arg24[%c0_80, %c0_81] : memref<1x4xf32, #tpu.memory_space<vmem>>, vector<1x4xf32>
    %162 = vector.broadcast %161 : vector<1x4xf32> to vector<32x4xf32>
    %163 = arith.addf %160, %162 : vector<32x4xf32>
    %c0_82 = arith.constant 0 : index
    %c0_83 = arith.constant 0 : index
    %164 = vector.load %arg25[%c0_82, %c0_83] : memref<32x4xf32, #tpu.memory_space<vmem>>, vector<32x4xf32>
    tpu.vector_store %arg25[%c0_82, %c0_83], %163 {strides = array<i32>} : memref<32x4xf32, #tpu.memory_space<vmem>>, vector<32x4xf32>,
    return
  }
  func.func @transform_0(%arg0: i32) -> (i32, i32) {
    %c0_i32 = arith.constant 0 : i32
    %c0_i32_0 = arith.constant 0 : i32
    %c0_i32_1 = arith.constant 0 : i32
    return %c0_i32, %c0_i32_0 : i32, i32
  }
  func.func @transform_1(%arg0: i32) -> (i32, i32) {
    %c0_i32 = arith.constant 0 : i32
    %c0_i32_0 = arith.constant 0 : i32
    %c0_i32_1 = arith.constant 0 : i32
    return %c0_i32, %c0_i32_0 : i32, i32
  }
  func.func @transform_2(%arg0: i32) -> (i32, i32) {
    %c0_i32 = arith.constant 0 : i32
    %c0_i32_0 = arith.constant 0 : i32
    %c0_i32_1 = arith.constant 0 : i32
    return %c0_i32, %c0_i32_0 : i32, i32
  }
  func.func @transform_3(%arg0: i32) -> (i32, i32) {
    %c0_i32 = arith.constant 0 : i32
    %c0_i32_0 = arith.constant 0 : i32
    %c0_i32_1 = arith.constant 0 : i32
    return %c0_i32, %c0_i32_0 : i32, i32
  }
  func.func @transform_4(%arg0: i32) -> (i32, i32) {
    %c0_i32 = arith.constant 0 : i32
    %c0_i32_0 = arith.constant 0 : i32
    %c0_i32_1 = arith.constant 0 : i32
    return %c0_i32, %c0_i32_0 : i32, i32
  }
  func.func @transform_5(%arg0: i32) -> (i32, i32) {
    %c0_i32 = arith.constant 0 : i32
    %c0_i32_0 = arith.constant 0 : i32
    %c0_i32_1 = arith.constant 0 : i32
    return %c0_i32, %c0_i32_0 : i32, i32
  }
  func.func @transform_6(%arg0: i32) -> (i32, i32) {
    %c0_i32 = arith.constant 0 : i32
    %c0_i32_0 = arith.constant 0 : i32
    %c0_i32_1 = arith.constant 0 : i32
    return %c0_i32, %c0_i32_0 : i32, i32
  }
  func.func @transform_7(%arg0: i32) -> (i32, i32) {
    %c0_i32 = arith.constant 0 : i32
    %c0_i32_0 = arith.constant 0 : i32
    %c0_i32_1 = arith.constant 0 : i32
    return %c0_i32, %c0_i32_0 : i32, i32
  }
  func.func @transform_8(%arg0: i32) -> (i32, i32) {
    %c0_i32 = arith.constant 0 : i32
    %c0_i32_0 = arith.constant 0 : i32
    %c0_i32_1 = arith.constant 0 : i32
    return %c0_i32, %c0_i32_0 : i32, i32
  }
  func.func @transform_9(%arg0: i32) -> (i32, i32) {
    %c0_i32 = arith.constant 0 : i32
    %c0_i32_0 = arith.constant 0 : i32
    %c0_i32_1 = arith.constant 0 : i32
    return %c0_i32, %c0_i32_0 : i32, i32
  }
  func.func @transform_10(%arg0: i32) -> (i32, i32) {
    %c0_i32 = arith.constant 0 : i32
    %c0_i32_0 = arith.constant 0 : i32
    %c0_i32_1 = arith.constant 0 : i32
    return %c0_i32, %c0_i32_0 : i32, i32
  }
  func.func @transform_11(%arg0: i32) -> (i32, i32) {
    %c0_i32 = arith.constant 0 : i32
    %c0_i32_0 = arith.constant 0 : i32
    %c0_i32_1 = arith.constant 0 : i32
    return %c0_i32, %c0_i32_0 : i32, i32
  }
  func.func @transform_12(%arg0: i32) -> (i32, i32) {
    %c0_i32 = arith.constant 0 : i32
    %c0_i32_0 = arith.constant 0 : i32
    %c0_i32_1 = arith.constant 0 : i32
    return %c0_i32, %c0_i32_0 : i32, i32
  }
  func.func @transform_13(%arg0: i32) -> (i32, i32) {
    %c0_i32 = arith.constant 0 : i32
    %c0_i32_0 = arith.constant 0 : i32
    %c0_i32_1 = arith.constant 0 : i32
    return %c0_i32, %c0_i32_0 : i32, i32
  }
  func.func @transform_14(%arg0: i32) -> (i32, i32) {
    %c0_i32 = arith.constant 0 : i32
    %c0_i32_0 = arith.constant 0 : i32
    %c0_i32_1 = arith.constant 0 : i32
    return %c0_i32, %c0_i32_0 : i32, i32
  }
  func.func @transform_15(%arg0: i32) -> (i32, i32) {
    %c0_i32 = arith.constant 0 : i32
    %c0_i32_0 = arith.constant 0 : i32
    %c0_i32_1 = arith.constant 0 : i32
    return %c0_i32, %c0_i32_0 : i32, i32
  }
  func.func @transform_16(%arg0: i32) -> (i32, i32) {
    %c0_i32 = arith.constant 0 : i32
    %c0_i32_0 = arith.constant 0 : i32
    %c0_i32_1 = arith.constant 0 : i32
    return %c0_i32, %c0_i32_0 : i32, i32
  }
  func.func @transform_17(%arg0: i32) -> (i32, i32) {
    %c0_i32 = arith.constant 0 : i32
    %c0_i32_0 = arith.constant 0 : i32
    %c0_i32_1 = arith.constant 0 : i32
    return %c0_i32, %c0_i32_0 : i32, i32
  }
  func.func @transform_18(%arg0: i32) -> (i32, i32) {
    %c0_i32 = arith.constant 0 : i32
    %c0_i32_0 = arith.constant 0 : i32
    %c0_i32_1 = arith.constant 0 : i32
    return %c0_i32, %c0_i32_0 : i32, i32
  }
  func.func @transform_19(%arg0: i32) -> (i32, i32) {
    %c0_i32 = arith.constant 0 : i32
    %c0_i32_0 = arith.constant 0 : i32
    %c0_i32_1 = arith.constant 0 : i32
    return %c0_i32, %c0_i32_0 : i32, i32
  }
  func.func @transform_20(%arg0: i32) -> (i32, i32) {
    %c0_i32 = arith.constant 0 : i32
    %c0_i32_0 = arith.constant 0 : i32
    %c0_i32_1 = arith.constant 0 : i32
    return %c0_i32, %c0_i32_0 : i32, i32
  }
  func.func @transform_21(%arg0: i32) -> (i32, i32) {
    %c0_i32 = arith.constant 0 : i32
    %c0_i32_0 = arith.constant 0 : i32
    %c0_i32_1 = arith.constant 0 : i32
    return %c0_i32, %c0_i32_0 : i32, i32
  }
  func.func @transform_22(%arg0: i32) -> (i32, i32) {
    %c0_i32 = arith.constant 0 : i32
    %c0_i32_0 = arith.constant 0 : i32
    %c0_i32_1 = arith.constant 0 : i32
    return %c0_i32, %c0_i32_0 : i32, i32
  }
  func.func @transform_23(%arg0: i32) -> (i32, i32) {
    %c0_i32 = arith.constant 0 : i32
    %c0_i32_0 = arith.constant 0 : i32
    %c0_i32_1 = arith.constant 0 : i32
    return %c0_i32, %c0_i32_0 : i32, i32
  }
  func.func @transform_24(%arg0: i32) -> (i32, i32) {
    %c0_i32 = arith.constant 0 : i32
    %c0_i32_0 = arith.constant 0 : i32
    %c0_i32_1 = arith.constant 0 : i32
    return %c0_i32, %c0_i32_0 : i32, i32
  }
}

</mosaic_0001>

<bundles_post_ra>
// kernel: tpu_custom_call.1
= control target key start
LH: loop header
LB: loop body
LE: loop exit
PB: predicated region body
PF: predicated region fallthrough
CT: control target
= control target key end

     0   :  { %vm101_vm0 = vcmask 1043456   ;;  %vm94_vm1 = vcmask 64512   ;;  %vm175_vm2 = vcmask 130048   ;;  %v1598_v24 = vmov 0.0   ;;  %s1600_s30 = smov 8   ;;  %s1946_s2 = inlined_call_operand.vmem [shape: bf16[8,16], index: 2, kind: input, shape index: {}]   ;;  %s1947_s0 = inlined_call_operand.vmem [shape: f32[32,8], index: 0, kind: input, shape index: {}]   ;;  %s1948_s4 = inlined_call_operand.vmem [shape: bf16[16,8], index: 4, kind: input, shape index: {}]   ;;  %s1949_s3 = inlined_call_operand.vmem [shape: f32[1,16], index: 3, kind: input, shape index: {}]   ;;  %s1950_s1 = inlined_call_operand.vmem [shape: bf16[16,16], index: 1, kind: input, shape index: {}]   ;;  %s1951_s5 = inlined_call_operand.vmem [shape: f32[1,8], index: 5, kind: input, shape index: {}]   ;;  %s1952_s6 = inlined_call_operand.vmem [shape: bf16[16,32], index: 6, kind: input, shape index: {}]   ;;  %s1953_s7 = inlined_call_operand.vmem [shape: f32[1,32], index: 7, kind: input, shape index: {}]   ;;  %s1954_s14 = inlined_call_operand.vmem [shape: f32[1,32], index: 14, kind: input, shape index: {}]   ;;  %s1955_s15 = inlined_call_operand.vmem [shape: f32[1,32], index: 15, kind: input, shape index: {}]   ;;  %s1956_s8 = inlined_call_operand.vmem [shape: bf16[64,32], index: 8, kind: input, shape index: {}]   ;;  %s1957_s9 = inlined_call_operand.vmem [shape: f32[1,32], index: 9, kind: input, shape index: {}]   ;;  %s1958_s16 = inlined_call_operand.vmem [shape: f32[1,32], index: 16, kind: input, shape index: {}]   ;;  %s1959_s17 = inlined_call_operand.vmem [shape: f32[1,32], index: 17, kind: input, shape index: {}]   ;;  %s1960_s10 = inlined_call_operand.vmem [shape: bf16[64,32], index: 10, kind: input, shape index: {}]   ;;  %s1961_s11 = inlined_call_operand.vmem [shape: f32[1,32], index: 11, kind: input, shape index: {}]   ;;  %s1962_s18 = inlined_call_operand.vmem [shape: f32[1,32], index: 18, kind: input, shape index: {}]   ;;  %s1963_s19 = inlined_call_operand.vmem [shape: f32[1,32], index: 19, kind: input, shape index: {}]   ;;  %s1964_s12 = inlined_call_operand.vmem [shape: bf16[64,32], index: 12, kind: input, shape index: {}]   ;;  %s1965_s20 = inlined_call_operand.vmem [shape: bf16[32,16], index: 20, kind: input, shape index: {}]   ;;  %s1966_s13 = inlined_call_operand.vmem [shape: f32[1,32], index: 13, kind: input, shape index: {}]   ;;  %s1967_s22 = inlined_call_operand.vmem [shape: bf16[16,4], index: 22, kind: input, shape index: {}]   ;;  %s1968_s21 = inlined_call_operand.vmem [shape: f32[1,16], index: 21, kind: input, shape index: {}]   ;;  %s1969_s23 = inlined_call_operand.vmem [shape: f32[1,4], index: 23, kind: input, shape index: {}]   ;;  %s1970_s24 = inlined_call_operand.vmem [shape: f32[32,4], index: 24, kind: output, shape index: {}]  }
   0x1   :  { %1972 = sst [smem:[#allocation2_spill]] %s1946_s2  ;;  %vm1599_vm3 = vmmov 0   ;;  %vm405_vm4 = vcmask 261120   ;;  %vm612_vm5 = vcmask 523264   ;;  %vm1338_vm6 = vcmask 31744  }
   0x2   :  { %1973 = sst [smem:[#allocation3_spill]] %s1947_s0 }
   0x3   :  { %1974 = sst [smem:[#allocation4_spill]] %s1948_s4 }
   0x4   :  { %1975 = sst [smem:[#allocation5_spill]] %s1949_s3 }
   0x5   :  { %1976 = sst [smem:[#allocation6_spill]] %s1950_s1 }
   0x6   :  { %1977 = sst [smem:[#allocation7_spill]] %s1951_s5 }
   0x7   :  { %1978 = sst [smem:[#allocation8_spill]] %s1952_s6 }
   0x8   :  { %1979 = sst [smem:[#allocation9_spill]] %s1953_s7 }
   0x9   :  { %1980 = sst [smem:[#allocation10_spill]] %s1954_s14 }
   0xa   :  { %s1981_s27 = sld [smem:[#allocation2_spill]] }
   0xb   :  { %s1982_s4 = sld [smem:[#allocation3_spill]] }
   0xc   :  { %s1983_s0 = sld [smem:[#allocation4_spill]] }
   0xd   :  { %s1986_s7 = sld [smem:[#allocation6_spill]] }
   0xe   :  { %s1987_s14 = sld [smem:[#allocation8_spill]] }
   0xf   :  { %s1988_s5 = sld [smem:[#allocation9_spill]] }
  0x10   :  { %v86_v0 = vld [vmem:[%s1981_s27] sm:$0xf]  ;;  %s1984_s27 = sld [smem:[#allocation5_spill]] }
  0x11   :  { %v80_v1 = vld [vmem:[%s1982_s4] sm:$0xff]  ;;  %v81_v2 = vld [vmem:[%s1982_s4 + $0x8] sm:$0xff]  ;;  %1569 = vmatprep.subr.msk.bf16.mxu0 %vm101_vm0, %v86_v0  ;;  %v103_v3 = vsel %vm101_vm0, %v86_v0, 0  ;;  %v82_v5 = vld [vmem:[%s1982_s4 + $0x10] sm:$0xff]  ;;  %s1989_s28 = sld [smem:[#allocation10_spill]] }
  0x12   :  { %v84_v4 = vpack.c.bf16 %v81_v2, %v80_v1  ;;  %v83_v6 = vld [vmem:[%s1982_s4 + $0x18] sm:$0xff]  ;;  %1454 = vmatpush3.bf16.msra.mxu0 %v103_v3  ;;  %v1574_v8 = vld [vmem:[%s1983_s0] sm:$0xff]   ;;  %s1985_s4 = sld [smem:[#allocation7_spill]] }
  0x13   :  { %v85_v7 = vpack.c.bf16 %v83_v6, %v82_v5  ;;  %1459 = vmatprep.subr.bf16.mxu1 %v1574_v8  ;;  %1465 = vmatprep.subr.bf16.mxu0 %v1598_v24  ;;  %v1764_v35 = vld [vmem:[%s1986_s7] sm:$0xff]  }
  0x14   :  { %1455 = vmatprep.mubr.msk.bf16.mxu0 %vm94_vm1, %v84_v4  ;;  %1460 = vmatpush3.bf16.msra.mxu1 %v1574_v8  ;;  %v1576_v37 = vld [vmem:[%s1987_s14] sm:$0xff]  }
  0x15   :  { %1456 = vmatmul.mubr.msk.bf16.vlgmr.msra.gmra.mxu0 %vm94_vm1, %v85_v7  ;;  %1471 = vmatprep.subr.bf16.mxu1 %v1598_v24  ;;  %v1357_v54 = vld [vmem:[%s1988_s5] ss:$0 sm:$0xff] }
  0x16   :  { %v1347_v11 = vld [vmem:[%s1984_s27] ss:$0 sm:$0xff]  ;;  %1467 = vmatprep.mubr.msk.bf16.mxu0 %vm1599_vm3, %v1598_v24 }
  0x18   :  { %v1350_v26 = vld [vmem:[%s1985_s4] ss:$0 sm:$0xff] }
  0xd5   :  { %v1457_v9 = vpop.f32.mrf.mxu0 }
  0xd6   :  { %v148_v15 = vadd.f32 %v1457_v9, %v1347_v11 }
  0xd7   :  { %v139_v10 = vpop.f32.mrf.mxu0 }
  0xd8   :  { %v140_v13 = vadd.f32 %v1347_v11, %v139_v10  ;;  %v156_v21 = vmax.f32 %v148_v15, 0.0 }
  0xd9   :  { %v1458_v12 = vpop.f32.mrf.mxu0 }
  0xda   :  { %v151_v14 = vadd.f32 %v1458_v12, %v1347_v11  ;;  %v154_v19 = vmax.f32 %v140_v13, 0.0 }
  0xdb   :  { %v142_v16 = vpop.f32.mrf.mxu0 }
  0xdc   :  { %v143_v17 = vadd.f32 %v1347_v11, %v142_v16  ;;  %v157_v18 = vmax.f32 %v151_v14, 0.0 }
  0xde   :  { %v155_v20 = vmax.f32 %v143_v17, 0.0  ;;  %v159_v23 = vpack.c.bf16 %v157_v18, %v156_v21 }
  0xe0   :  { %v158_v22 = vpack.c.bf16 %v155_v20, %v154_v19 }
  0xe2   :  { %1461 = vmatprep.mubr.msk.bf16.mxu1 %vm175_vm2, %v158_v22 }
  0xe3   :  { %1462 = vmatmul.mubr.msk.bf16.vlgmr.msra.gmra.mxu1 %vm175_vm2, %v159_v23 }
  0xe4   :  { %1473 = vmatprep.mubr.msk.bf16.mxu1 %vm1599_vm3, %v1598_v24 }
 0x1a3   :  { %v1463_v25 = vpop.f32.mrf.mxu1 }
 0x1a4   :  { %v225_v29 = vadd.f32 %v1463_v25, %v1350_v26 }
 0x1a5   :  { %v216_v27 = vpop.f32.mrf.mxu1 }
 0x1a6   :  { %v217_v32 = vadd.f32 %v1350_v26, %v216_v27 }
 0x1a7   :  { %v1464_v28 = vpop.f32.mrf.mxu1 }
 0x1a8   :  { %v228_v30 = vadd.f32 %v1464_v28, %v1350_v26 }
 0x1a9   :  { %v219_v31 = vpop.f32.mrf.mxu1 }
 0x1aa   :  { %v232_v33 = vpack.c.bf16 %v228_v30, %v225_v29  ;;  %v220_v34 = vadd.f32 %v1350_v26, %v219_v31 }
 0x1ac   :  { %1472 = vmatpush3.bf16.msra.mxu1 %v232_v33  ;;  %v231_v36 = vpack.c.bf16 %v220_v34, %v217_v32 }
 0x1ad   :  { %1483 = vmatprep.subr.bf16.mxu1 %v1598_v24 }
 0x1ae   :  { %327 = vrot.lane.b32.xlu0 %v231_v36, %s1600_s30  ;;  %1466 = vmatpush3.bf16.msra.mxu0 %v231_v36 }
 0x1af   :  { %1474 = vmatmul.mubr.msk.bf16.vlgmr.msra.gmra.mxu1 %vm175_vm2, %v1764_v35  ;;  %1477 = vmatprep.subr.bf16.mxu0 %v1576_v37 }
 0x1b0   :  { %1485 = vmatprep.mubr.msk.bf16.mxu1 %vm1599_vm3, %v1598_v24 }
 0x1b1   :  { %1468 = vmatmul.mubr.msk.bf16.vlgmr.msra.gmra.mxu0 %vm175_vm2, %v1764_v35 }
 0x1b2   :  { %329 = vrot.lane.b32.xlu0 %v232_v33, %s1600_s30  ;;  %1478 = vmatpush3.bf16.msra.mxu0 %v1576_v37  ;;  %v1361_v37 = vld [vmem:[%s1989_s28] ss:$0 sm:$0xff] }
 0x1b3   :  { %1489 = vmatprep.subr.bf16.mxu0 %v1598_v24 }
 0x220   :  { %v328_v41 = vpop.permute.xlu0 %327 }
 0x224   :  { %v330_v49 = vpop.permute.xlu0 %329 }
 0x26f   :  { %v317_v38 = vpop.f32.mrf.mxu1 }
 0x271   :  { %v275_v39 = vpop.f32.mrf.mxu0  ;;  %v1475_v40 = vpop.f32.mrf.mxu1 }
 0x273   :  { %v1469_v42 = vpop.f32.mrf.mxu0  ;;  %v320_v43 = vpop.f32.mrf.mxu1 }
 0x274   :  { %v324_v44 = vpack.c.bf16 %v320_v43, %v317_v38  ;;  %v1362_v42 = vld [vmem:[%s1955_s15] ss:$0 sm:$0xff]  ;;  %s1601_s15 = smov 32  }
 0x275   :  { %v278_v45 = vpop.f32.mrf.mxu0  ;;  %v1476_v46 = vpop.f32.mrf.mxu1 }
 0x276   :  { %v282_v47 = vpack.c.bf16 %v278_v45, %v275_v39  ;;  %v336_v51 = vsel %vm94_vm1, %v324_v44, %v330_v49 }
 0x277   :  { %v1470_v48 = vpop.f32.mrf.mxu0 }
 0x278   :  { %v333_v50 = vsel %vm94_vm1, %v282_v47, %v328_v41 }
 0x279   :  { %1479 = vmatprep.mubr.msk.bf16.mxu0 %vm175_vm2, %v333_v50 }
 0x27a   :  { %1480 = vmatmul.mubr.msk.bf16.vlgmr.msra.gmra.mxu0 %vm175_vm2, %v336_v51 }
 0x27b   :  { %1491 = vmatprep.mubr.msk.bf16.mxu0 %vm1599_vm3, %v1598_v24 }
 0x33a   :  { %v1481_v52 = vpop.f32.mrf.mxu0 }
 0x33b   :  { %v399_v58 = vadd.f32 %v1481_v52, %v1357_v54 }
 0x33c   :  { %v390_v53 = vpop.f32.mrf.mxu0 }
 0x33d   :  { %v391_v56 = vadd.f32 %v1357_v54, %v390_v53  ;;  %v409_v0 = vsel %vm405_vm4, %v399_v58, 0.0 }
 0x33e   :  { %v1482_v55 = vpop.f32.mrf.mxu0 }
 0x33f   :  { %v406_v60 = vsel %vm405_vm4, %v391_v56, 0.0  ;;  %v402_v61 = vadd.f32 %v1482_v55, %v1357_v54 }
 0x340   :  { %v393_v57 = vpop.f32.mrf.mxu0 }
 0x341   :  { %v394_v59 = vadd.f32 %v1357_v54, %v393_v57  ;;  %v411_v2 = vsel %vm405_vm4, %v402_v61, 0.0  ;;  %v1577_v57 = vld [vmem:[%s1956_s8 + $0x18] sm:$0xff]  }
 0x343   :  { %v407_v62 = vsel %vm405_vm4, %v394_v59, 0.0 }
 0x344   :  { %v408_v63 = vadd.f32 %v407_v62, %v406_v60  ;;  %v1580_v60 = vld [vmem:[%s1956_s8] sm:$0xff]  }
 0x346   :  { %v410_v1 = vadd.f32 %v409_v0, %v408_v63 }
 0x348   :  { %v412_v3 = vadd.f32 %v411_v2, %v410_v1 }
 0x34a   :  { %v413_v4 = vrot.slane %v412_v3, 4 }
 0x34c   :  { %v414_v5 = vadd.f32 %v413_v4, %v412_v3 }
 0x34e   :  { %v415_v6 = vrot.slane %v414_v5, 2 }
 0x350   :  { %v416_v7 = vadd.f32 %v415_v6, %v414_v5 }
 0x352   :  { %v417_v8 = vrot.slane %v416_v7, 1 }
 0x354   :  { %v418_v9 = vadd.f32 %v417_v8, %v416_v7 }
 0x356   :  { %v420_v10 = vmul.f32 0.03125, %v418_v9 }
 0x358   :  { %v421_v11 = vsub.f32 %v391_v56, %v420_v10  ;;  %v422_v12 = vsub.f32 %v394_v59, %v420_v10  ;;  %v423_v13 = vsub.f32 %v399_v58, %v420_v10  ;;  %v424_v14 = vsub.f32 %v402_v61, %v420_v10  ;;  %v1578_v58 = vld [vmem:[%s1956_s8 + $0x10] sm:$0xff]   ;;  %v1579_v59 = vld [vmem:[%s1956_s8 + $0x8] sm:$0xff]  }
 0x35a   :  { %v425_v15 = vmul.f32 %v421_v11, %v421_v11  ;;  %v426_v16 = vmul.f32 %v422_v12, %v422_v12  ;;  %v427_v17 = vmul.f32 %v423_v13, %v423_v13  ;;  %v428_v18 = vmul.f32 %v424_v14, %v424_v14 }
 0x35c   :  { %v429_v19 = vsel %vm405_vm4, %v425_v15, 0.0  ;;  %v430_v20 = vsel %vm405_vm4, %v426_v16, 0.0  ;;  %v432_v22 = vsel %vm405_vm4, %v427_v17, 0.0  ;;  %v434_v25 = vsel %vm405_vm4, %v428_v18, 0.0 }
 0x35d   :  { %v431_v21 = vadd.f32 %v430_v20, %v429_v19 }
 0x35f   :  { %v433_v23 = vadd.f32 %v432_v22, %v431_v21 }
 0x361   :  { %v435_v26 = vadd.f32 %v434_v25, %v433_v23 }
 0x363   :  { %v436_v27 = vrot.slane %v435_v26, 4 }
 0x365   :  { %v437_v28 = vadd.f32 %v436_v27, %v435_v26 }
 0x367   :  { %v438_v29 = vrot.slane %v437_v28, 2 }
 0x369   :  { %v439_v30 = vadd.f32 %v438_v29, %v437_v28 }
 0x36b   :  { %v440_v31 = vrot.slane %v439_v30, 1 }
 0x36d   :  { %v441_v32 = vadd.f32 %v440_v31, %v439_v30 }
 0x36f   :  { %v442_v33 = vmul.f32 0.03125, %v441_v32 }
 0x371   :  { %v443_v34 = vadd.f32 1e-05, %v442_v33 }
 0x373   :  { %1592 = vrsqrt.f32 %v443_v34 }
 0x380   :  { %v1593_v36 = vpop.eup %1592 }
 0x381   :  { %v446_v38 = vmul.f32 %v1593_v36, %v422_v12  ;;  %v447_v39 = vmul.f32 %v1593_v36, %v423_v13  ;;  %v448_v40 = vmul.f32 %v1593_v36, %v424_v14  ;;  %v445_v41 = vmul.f32 %v1593_v36, %v421_v11  ;;  %v1365_v13 = vld [vmem:[%s1957_s9] ss:$0 sm:$0xff] }
 0x383   :  { %v458_v43 = vmul.f32 %v1361_v37, %v447_v39  ;;  %v459_v44 = vmul.f32 %v1361_v37, %v448_v40  ;;  %v456_v45 = vmul.f32 %v1361_v37, %v445_v41  ;;  %v457_v46 = vmul.f32 %v1361_v37, %v446_v38 }
 0x385   :  { %v469_v47 = vadd.f32 %v1362_v42, %v458_v43  ;;  %v470_v48 = vadd.f32 %v1362_v42, %v459_v44  ;;  %v467_v49 = vadd.f32 %v1362_v42, %v456_v45  ;;  %v468_v50 = vadd.f32 %v1362_v42, %v457_v46 }
 0x387   :  { %v473_v51 = vmax.f32 %v469_v47, 0.0  ;;  %v474_v52 = vmax.f32 %v470_v48, 0.0  ;;  %v471_v53 = vmax.f32 %v467_v49, 0.0  ;;  %v472_v54 = vmax.f32 %v468_v50, 0.0 }
 0x389   :  { %v476_v55 = vpack.c.bf16 %v474_v52, %v473_v51  ;;  %v475_v56 = vpack.c.bf16 %v472_v54, %v471_v53 }
 0x38b   :  { %1490 = vmatpush3.bf16.msra.mxu0 %v476_v55  ;;  %563 = vrot.lane.b32.xlu1 %v475_v56, %s1601_s15 }
 0x38c   :  { %1484 = vmatpush3.bf16.msra.mxu1 %v475_v56  ;;  %1507 = vmatprep.subr.bf16.mxu0 %v1598_v24 }
 0x38d   :  { %1495 = vmatprep.subr.bf16.mxu1 %v1577_v57 }
 0x38e   :  { %1492 = vmatmul.mubr.msk.bf16.vlgmr.msra.gmra.mxu0 %vm175_vm2, %v1764_v35 }
 0x38f   :  { %1486 = vmatmul.mubr.msk.bf16.vlgmr.msra.gmra.mxu1 %vm175_vm2, %v1764_v35  ;;  %565 = vrot.lane.b32.xlu1 %v476_v55, %s1601_s15 }
 0x390   :  { %1496 = vmatpush3.bf16.msra.mxu1 %v1577_v57  ;;  %1509 = vmatprep.mubr.msk.bf16.mxu0 %vm1599_vm3, %v1598_v24 }
 0x391   :  { %1497 = vmatprep.subr.bf16.mxu1 %v1578_v58 }
 0x394   :  { %1498 = vmatpush3.bf16.msra.mxu1 %v1578_v58 }
 0x395   :  { %1499 = vmatprep.subr.bf16.mxu1 %v1579_v59 }
 0x398   :  { %1500 = vmatpush3.bf16.msra.mxu1 %v1579_v59 }
 0x399   :  { %1501 = vmatprep.subr.bf16.mxu1 %v1580_v60 }
 0x39c   :  { %1502 = vmatpush3.bf16.msra.mxu1 %v1580_v60  ;;  %v1372_v60 = vld [vmem:[%s1958_s16] ss:$0 sm:$0xff] }
 0x3fd   :  { %v564_v61 = vpop.permute.xlu1 %563 }
 0x401   :  { %v566_v5 = vpop.permute.xlu1 %565 }
 0x44e   :  { %v553_v62 = vpop.f32.mrf.mxu0 }
 0x44f   :  { %v511_v63 = vpop.f32.mrf.mxu1 }
 0x450   :  { %v1493_v0 = vpop.f32.mrf.mxu0 }
 0x451   :  { %v1487_v1 = vpop.f32.mrf.mxu1 }
 0x452   :  { %v556_v2 = vpop.f32.mrf.mxu0  ;;  %v1373_v1 = vld [vmem:[%s1959_s17] ss:$0 sm:$0xff] }
 0x453   :  { %v514_v3 = vpop.f32.mrf.mxu1  ;;  %v560_v4 = vpack.c.bf16 %v556_v2, %v553_v62 }
 0x454   :  { %v518_v6 = vpack.c.bf16 %v514_v3, %v511_v63  ;;  %v1494_v7 = vpop.f32.mrf.mxu0 }
 0x455   :  { %v572_v8 = vsel %vm405_vm4, %v560_v4, %v566_v5  ;;  %v1488_v9 = vpop.f32.mrf.mxu1 }
 0x456   :  { %v569_v10 = vsel %vm405_vm4, %v518_v6, %v564_v61 }
 0x457   :  { %1503 = vmatprep.mubr.msk.bf16.mxu1 %vm612_vm5, %v569_v10 }
 0x458   :  { %1504 = vmatmul.mubr.msk.bf16.vlgmr.msra.gmra.mxu1 %vm612_vm5, %v572_v8 }
 0x518   :  { %v1505_v11 = vpop.f32.mrf.mxu1 }
 0x519   :  { %v660_v17 = vadd.f32 %v1505_v11, %v1365_v13 }
 0x51a   :  { %v651_v12 = vpop.f32.mrf.mxu1 }
 0x51b   :  { %v652_v15 = vadd.f32 %v1365_v13, %v651_v12  ;;  %v669_v23 = vsel %vm405_vm4, %v660_v17, 0.0 }
 0x51c   :  { %v1506_v14 = vpop.f32.mrf.mxu1 }
 0x51d   :  { %v666_v19 = vsel %vm405_vm4, %v652_v15, 0.0  ;;  %v663_v20 = vadd.f32 %v1506_v14, %v1365_v13 }
 0x51e   :  { %v654_v16 = vpop.f32.mrf.mxu1 }
 0x51f   :  { %v655_v18 = vadd.f32 %v1365_v13, %v654_v16  ;;  %v671_v26 = vsel %vm405_vm4, %v663_v20, 0.0  ;;  %v1581_v16 = vld [vmem:[%s1960_s10 + $0x18] sm:$0xff]  }
 0x520   :  { %1519 = vmatprep.subr.bf16.mxu1 %v1581_v16 }
 0x521   :  { %v667_v21 = vsel %vm405_vm4, %v655_v18, 0.0  ;;  %1520 = vmatpush3.bf16.msra.mxu1 %v1581_v16 }
 0x522   :  { %v668_v22 = vadd.f32 %v667_v21, %v666_v19  ;;  %v1584_v19 = vld [vmem:[%s1960_s10] sm:$0xff]  }
 0x524   :  { %v670_v25 = vadd.f32 %v669_v23, %v668_v22 }
 0x526   :  { %v672_v27 = vadd.f32 %v671_v26, %v670_v25 }
 0x528   :  { %v673_v28 = vrot.slane %v672_v27, 4 }
 0x52a   :  { %v674_v29 = vadd.f32 %v673_v28, %v672_v27 }
 0x52c   :  { %v675_v30 = vrot.slane %v674_v29, 2 }
 0x52e   :  { %v676_v31 = vadd.f32 %v675_v30, %v674_v29 }
 0x530   :  { %v677_v32 = vrot.slane %v676_v31, 1 }
 0x532   :  { %v678_v33 = vadd.f32 %v677_v32, %v676_v31 }
 0x534   :  { %v679_v34 = vmul.f32 0.03125, %v678_v33 }
 0x536   :  { %v680_v36 = vsub.f32 %v652_v15, %v679_v34  ;;  %v681_v37 = vsub.f32 %v655_v18, %v679_v34  ;;  %v682_v38 = vsub.f32 %v660_v17, %v679_v34  ;;  %v683_v39 = vsub.f32 %v663_v20, %v679_v34  ;;  %v1582_v17 = vld [vmem:[%s1960_s10 + $0x10] sm:$0xff]   ;;  %v1583_v18 = vld [vmem:[%s1960_s10 + $0x8] sm:$0xff]  }
 0x537   :  { %1521 = vmatprep.subr.bf16.mxu1 %v1582_v17 }
 0x538   :  { %v684_v40 = vmul.f32 %v680_v36, %v680_v36  ;;  %v685_v41 = vmul.f32 %v681_v37, %v681_v37  ;;  %v686_v42 = vmul.f32 %v682_v38, %v682_v38  ;;  %v687_v43 = vmul.f32 %v683_v39, %v683_v39  ;;  %1522 = vmatpush3.bf16.msra.mxu1 %v1582_v17 }
 0x539   :  { %1523 = vmatprep.subr.bf16.mxu1 %v1583_v18 }
 0x53a   :  { %v688_v44 = vsel %vm405_vm4, %v684_v40, 0.0  ;;  %v689_v45 = vsel %vm405_vm4, %v685_v41, 0.0  ;;  %v691_v47 = vsel %vm405_vm4, %v686_v42, 0.0  ;;  %v693_v49 = vsel %vm405_vm4, %v687_v43, 0.0 }
 0x53b   :  { %v690_v46 = vadd.f32 %v689_v45, %v688_v44 }
 0x53c   :  { %1524 = vmatpush3.bf16.msra.mxu1 %v1583_v18 }
 0x53d   :  { %v692_v48 = vadd.f32 %v691_v47, %v690_v46  ;;  %1525 = vmatprep.subr.bf16.mxu1 %v1584_v19 }
 0x53f   :  { %v694_v50 = vadd.f32 %v693_v49, %v692_v48 }
 0x540   :  { %1526 = vmatpush3.bf16.msra.mxu1 %v1584_v19  ;;  %v1383_v19 = vld [vmem:[%s1962_s18] ss:$0 sm:$0xff] }
 0x541   :  { %v695_v51 = vrot.slane %v694_v50, 4 }
 0x543   :  { %v696_v52 = vadd.f32 %v695_v51, %v694_v50 }
 0x545   :  { %v697_v53 = vrot.slane %v696_v52, 2 }
 0x547   :  { %v698_v54 = vadd.f32 %v697_v53, %v696_v52 }
 0x549   :  { %v699_v55 = vrot.slane %v698_v54, 1 }
 0x54b   :  { %v700_v56 = vadd.f32 %v699_v55, %v698_v54 }
 0x54d   :  { %v701_v57 = vmul.f32 0.03125, %v700_v56 }
 0x54f   :  { %v702_v58 = vadd.f32 1e-05, %v701_v57 }
 0x551   :  { %1594 = vrsqrt.f32 %v702_v58 }
 0x55e   :  { %v1595_v59 = vpop.eup %1594 }
 0x55f   :  { %v705_v61 = vmul.f32 %v1595_v59, %v681_v37  ;;  %v706_v62 = vmul.f32 %v1595_v59, %v682_v38  ;;  %v707_v63 = vmul.f32 %v1595_v59, %v683_v39  ;;  %v704_v0 = vmul.f32 %v1595_v59, %v680_v36  ;;  %v1376_v38 = vld [vmem:[%s1961_s11] ss:$0 sm:$0xff] }
 0x561   :  { %v716_v2 = vmul.f32 %v1372_v60, %v705_v61  ;;  %v717_v3 = vmul.f32 %v1372_v60, %v706_v62  ;;  %v718_v4 = vmul.f32 %v1372_v60, %v707_v63  ;;  %v715_v5 = vmul.f32 %v1372_v60, %v704_v0 }
 0x563   :  { %v728_v6 = vadd.f32 %v1373_v1, %v717_v3  ;;  %v729_v7 = vadd.f32 %v1373_v1, %v718_v4  ;;  %v726_v8 = vadd.f32 %v1373_v1, %v715_v5  ;;  %v727_v9 = vadd.f32 %v1373_v1, %v716_v2 }
 0x565   :  { %v732_v10 = vmax.f32 %v728_v6, 0.0  ;;  %v733_v11 = vmax.f32 %v729_v7, 0.0  ;;  %v730_v12 = vmax.f32 %v726_v8, 0.0  ;;  %v731_v13 = vmax.f32 %v727_v9, 0.0 }
 0x567   :  { %v735_v14 = vpack.c.bf16 %v733_v11, %v732_v10  ;;  %v734_v15 = vpack.c.bf16 %v731_v13, %v730_v12 }
 0x569   :  { %824 = vrot.lane.b32.xlu1 %v735_v14, %s1601_s15  ;;  %822 = vrot.lane.b32.xlu0 %v734_v15, %s1601_s15 }
 0x56a   :  { %1508 = vmatpush3.bf16.msra.mxu0 %v734_v15 }
 0x56b   :  { %1513 = vmatprep.subr.bf16.mxu0 %v1598_v24 }
 0x56d   :  { %1510 = vmatmul.mubr.msk.bf16.vlgmr.msra.gmra.mxu0 %vm175_vm2, %v1764_v35 }
 0x56e   :  { %1514 = vmatpush3.bf16.msra.mxu0 %v735_v14  ;;  %1515 = vmatprep.mubr.msk.bf16.mxu0 %vm1599_vm3, %v1598_v24 }
 0x56f   :  { %1531 = vmatprep.subr.bf16.mxu0 %v1598_v24 }
 0x575   :  { %1516 = vmatmul.mubr.msk.bf16.vlgmr.msra.gmra.mxu0 %vm175_vm2, %v1764_v35 }
 0x576   :  { %1533 = vmatprep.mubr.msk.bf16.mxu0 %vm1599_vm3, %v1598_v24 }
 0x5db   :  { %v823_v25 = vpop.permute.xlu0 %822  ;;  %v825_v32 = vpop.permute.xlu1 %824 }
 0x62d   :  { %v770_v20 = vpop.f32.mrf.mxu0 }
 0x62f   :  { %v1511_v21 = vpop.f32.mrf.mxu0 }
 0x631   :  { %v773_v22 = vpop.f32.mrf.mxu0 }
 0x632   :  { %v777_v23 = vpack.c.bf16 %v773_v22, %v770_v20 }
 0x633   :  { %v1512_v26 = vpop.f32.mrf.mxu0 }
 0x634   :  { %v828_v27 = vsel %vm405_vm4, %v777_v23, %v823_v25  ;;  %v1384_v25 = vld [vmem:[%s1963_s19] ss:$0 sm:$0xff] }
 0x635   :  { %v812_v28 = vpop.f32.mrf.mxu0  ;;  %1527 = vmatprep.mubr.msk.bf16.mxu1 %vm612_vm5, %v828_v27 }
 0x637   :  { %v1517_v29 = vpop.f32.mrf.mxu0 }
 0x639   :  { %v815_v30 = vpop.f32.mrf.mxu0 }
 0x63a   :  { %v819_v31 = vpack.c.bf16 %v815_v30, %v812_v28 }
 0x63b   :  { %v1518_v33 = vpop.f32.mrf.mxu0 }
 0x63c   :  { %v831_v34 = vsel %vm405_vm4, %v819_v31, %v825_v32 }
 0x63d   :  { %1528 = vmatmul.mubr.msk.bf16.vlgmr.msra.gmra.mxu1 %vm612_vm5, %v831_v34 }
 0x6fd   :  { %v1529_v36 = vpop.f32.mrf.mxu1 }
 0x6fe   :  { %v918_v42 = vadd.f32 %v1529_v36, %v1376_v38 }
 0x6ff   :  { %v909_v37 = vpop.f32.mrf.mxu1 }
 0x700   :  { %v910_v40 = vadd.f32 %v1376_v38, %v909_v37  ;;  %v927_v48 = vsel %vm405_vm4, %v918_v42, 0.0 }
 0x701   :  { %v1530_v39 = vpop.f32.mrf.mxu1 }
 0x702   :  { %v924_v44 = vsel %vm405_vm4, %v910_v40, 0.0  ;;  %v921_v45 = vadd.f32 %v1530_v39, %v1376_v38 }
 0x703   :  { %v912_v41 = vpop.f32.mrf.mxu1 }
 0x704   :  { %v913_v43 = vadd.f32 %v1376_v38, %v912_v41  ;;  %v929_v50 = vsel %vm405_vm4, %v921_v45, 0.0  ;;  %v1585_v41 = vld [vmem:[%s1964_s12 + $0x18] sm:$0xff]  }
 0x705   :  { %1543 = vmatprep.subr.bf16.mxu1 %v1585_v41 }
 0x706   :  { %v925_v46 = vsel %vm405_vm4, %v913_v43, 0.0  ;;  %1544 = vmatpush3.bf16.msra.mxu1 %v1585_v41 }
 0x707   :  { %v926_v47 = vadd.f32 %v925_v46, %v924_v44 }
 0x709   :  { %v928_v49 = vadd.f32 %v927_v48, %v926_v47 }
 0x70b   :  { %v930_v51 = vadd.f32 %v929_v50, %v928_v49 }
 0x70d   :  { %v931_v52 = vrot.slane %v930_v51, 4 }
 0x70f   :  { %v932_v53 = vadd.f32 %v931_v52, %v930_v51 }
 0x711   :  { %v933_v54 = vrot.slane %v932_v53, 2 }
 0x713   :  { %v934_v55 = vadd.f32 %v933_v54, %v932_v53 }
 0x715   :  { %v935_v56 = vrot.slane %v934_v55, 1 }
 0x717   :  { %v936_v57 = vadd.f32 %v935_v56, %v934_v55 }
 0x719   :  { %v937_v58 = vmul.f32 0.03125, %v936_v57  ;;  %v1589_v57 = vld [vmem:[%s1965_s20 + $0x8] sm:$0xff]  }
 0x71b   :  { %v938_v59 = vsub.f32 %v910_v40, %v937_v58  ;;  %v939_v60 = vsub.f32 %v913_v43, %v937_v58  ;;  %v940_v61 = vsub.f32 %v918_v42, %v937_v58  ;;  %v941_v62 = vsub.f32 %v921_v45, %v937_v58  ;;  %v1586_v42 = vld [vmem:[%s1964_s12 + $0x10] sm:$0xff]   ;;  %v1587_v43 = vld [vmem:[%s1964_s12 + $0x8] sm:$0xff]   ;;  %v1590_v58 = vld [vmem:[%s1965_s20] sm:$0xff]  }
 0x71c   :  { %1545 = vmatprep.subr.bf16.mxu1 %v1586_v42 }
 0x71d   :  { %v942_v63 = vmul.f32 %v938_v59, %v938_v59  ;;  %v943_v0 = vmul.f32 %v939_v60, %v939_v60  ;;  %v944_v1 = vmul.f32 %v940_v61, %v940_v61  ;;  %v945_v2 = vmul.f32 %v941_v62, %v941_v62  ;;  %1546 = vmatpush3.bf16.msra.mxu1 %v1586_v42 }
 0x71e   :  { %1547 = vmatprep.subr.bf16.mxu1 %v1587_v43 }
 0x71f   :  { %v946_v3 = vsel %vm405_vm4, %v942_v63, 0.0  ;;  %v947_v4 = vsel %vm405_vm4, %v943_v0, 0.0  ;;  %v949_v6 = vsel %vm405_vm4, %v944_v1, 0.0  ;;  %v951_v8 = vsel %vm405_vm4, %v945_v2, 0.0 }
 0x720   :  { %v948_v5 = vadd.f32 %v947_v4, %v946_v3 }
 0x721   :  { %1548 = vmatpush3.bf16.msra.mxu1 %v1587_v43 }
 0x722   :  { %v950_v7 = vadd.f32 %v949_v6, %v948_v5  ;;  %v1591_v6 = vld [vmem:[%s1967_s22] sm:$0xff]  }
 0x724   :  { %v952_v9 = vadd.f32 %v951_v8, %v950_v7 }
 0x726   :  { %v953_v10 = vrot.slane %v952_v9, 4 }
 0x728   :  { %v954_v11 = vadd.f32 %v953_v10, %v952_v9  ;;  %v1394_v9 = vld [vmem:[%s1968_s21] ss:$0 sm:$0xff] }
 0x72a   :  { %v955_v12 = vrot.slane %v954_v11, 2 }
 0x72c   :  { %v956_v13 = vadd.f32 %v955_v12, %v954_v11 }
 0x72e   :  { %v957_v14 = vrot.slane %v956_v13, 1 }
 0x730   :  { %v958_v15 = vadd.f32 %v957_v14, %v956_v13 }
 0x732   :  { %v959_v16 = vmul.f32 0.03125, %v958_v15 }
 0x734   :  { %v960_v17 = vadd.f32 1e-05, %v959_v16 }
 0x736   :  { %1596 = vrsqrt.f32 %v960_v17 }
 0x743   :  { %v1597_v18 = vpop.eup %1596 }
 0x744   :  { %v963_v20 = vmul.f32 %v1597_v18, %v939_v60  ;;  %v964_v21 = vmul.f32 %v1597_v18, %v940_v61  ;;  %v965_v22 = vmul.f32 %v1597_v18, %v941_v62  ;;  %v962_v23 = vmul.f32 %v1597_v18, %v938_v59  ;;  %v1387_v62 = vld [vmem:[%s1966_s13] ss:$0 sm:$0xff] }
 0x746   :  { %v974_v26 = vmul.f32 %v1383_v19, %v963_v20  ;;  %v975_v27 = vmul.f32 %v1383_v19, %v964_v21  ;;  %v976_v28 = vmul.f32 %v1383_v19, %v965_v22  ;;  %v973_v29 = vmul.f32 %v1383_v19, %v962_v23  ;;  %v1399_v22 = vld [vmem:[%s1969_s23] ss:$0 sm:$0xff] }
 0x748   :  { %v986_v30 = vadd.f32 %v1384_v25, %v975_v27  ;;  %v987_v31 = vadd.f32 %v1384_v25, %v976_v28  ;;  %v984_v32 = vadd.f32 %v1384_v25, %v973_v29  ;;  %v985_v33 = vadd.f32 %v1384_v25, %v974_v26 }
 0x74a   :  { %v990_v34 = vmax.f32 %v986_v30, 0.0  ;;  %v991_v36 = vmax.f32 %v987_v31, 0.0  ;;  %v988_v37 = vmax.f32 %v984_v32, 0.0  ;;  %v989_v38 = vmax.f32 %v985_v33, 0.0 }
 0x74c   :  { %v993_v39 = vpack.c.bf16 %v991_v36, %v990_v34  ;;  %v992_v40 = vpack.c.bf16 %v989_v38, %v988_v37 }
 0x74e   :  { %1082 = vrot.lane.b32.xlu1 %v993_v39, %s1601_s15  ;;  %1080 = vrot.lane.b32.xlu0 %v992_v40, %s1601_s15 }
 0x74f   :  { %1532 = vmatpush3.bf16.msra.mxu0 %v992_v40 }
 0x750   :  { %1537 = vmatprep.subr.bf16.mxu0 %v1598_v24 }
 0x752   :  { %1534 = vmatmul.mubr.msk.bf16.vlgmr.msra.gmra.mxu0 %vm175_vm2, %v1764_v35 }
 0x753   :  { %1538 = vmatpush3.bf16.msra.mxu0 %v993_v39  ;;  %1539 = vmatprep.mubr.msk.bf16.mxu0 %vm1599_vm3, %v1598_v24  ;;  %v1588_v24 = vld [vmem:[%s1964_s12] sm:$0xff]  }
 0x754   :  { %1549 = vmatprep.subr.bf16.mxu1 %v1588_v24  ;;  %1555 = vmatprep.subr.bf16.mxu0 %v1589_v57 }
 0x755   :  { %1550 = vmatpush3.bf16.msra.mxu1 %v1588_v24 }
 0x75a   :  { %1540 = vmatmul.mubr.msk.bf16.vlgmr.msra.gmra.mxu0 %vm175_vm2, %v1764_v35 }
 0x75b   :  { %1556 = vmatpush3.bf16.msra.mxu0 %v1589_v57 }
 0x75c   :  { %1557 = vmatprep.subr.bf16.mxu0 %v1590_v58 }
 0x75f   :  { %1558 = vmatpush3.bf16.msra.mxu0 %v1590_v58 }
 0x760   :  { %1563 = vmatprep.subr.bf16.mxu0 %v1591_v6 }
 0x7c0   :  { %v1081_v47 = vpop.permute.xlu0 %1080  ;;  %v1083_v54 = vpop.permute.xlu1 %1082 }
 0x812   :  { %v1028_v35 = vpop.f32.mrf.mxu0 }
 0x814   :  { %v1535_v44 = vpop.f32.mrf.mxu0 }
 0x816   :  { %v1031_v45 = vpop.f32.mrf.mxu0 }
 0x817   :  { %v1035_v46 = vpack.c.bf16 %v1031_v45, %v1028_v35 }
 0x818   :  { %v1536_v48 = vpop.f32.mrf.mxu0 }
 0x819   :  { %v1086_v49 = vsel %vm405_vm4, %v1035_v46, %v1081_v47 }
 0x81a   :  { %v1070_v50 = vpop.f32.mrf.mxu0  ;;  %1551 = vmatprep.mubr.msk.bf16.mxu1 %vm612_vm5, %v1086_v49 }
 0x81c   :  { %v1541_v51 = vpop.f32.mrf.mxu0 }
 0x81e   :  { %v1073_v52 = vpop.f32.mrf.mxu0 }
 0x81f   :  { %v1077_v53 = vpack.c.bf16 %v1073_v52, %v1070_v50 }
 0x820   :  { %v1542_v55 = vpop.f32.mrf.mxu0 }
 0x821   :  { %v1089_v56 = vsel %vm405_vm4, %v1077_v53, %v1083_v54 }
 0x822   :  { %1552 = vmatmul.mubr.msk.bf16.vlgmr.msra.gmra.mxu1 %vm612_vm5, %v1089_v56 }
 0x8e2   :  { %v1553_v59 = vpop.f32.mrf.mxu1 }
 0x8e3   :  { %v1176_v3 = vadd.f32 %v1553_v59, %v1387_v62 }
 0x8e4   :  { %v1167_v60 = vpop.f32.mrf.mxu1 }
 0x8e5   :  { %v1168_v1 = vadd.f32 %v1387_v62, %v1167_v60 }
 0x8e6   :  { %v1554_v61 = vpop.f32.mrf.mxu1 }
 0x8e7   :  { %v1179_v63 = vadd.f32 %v1554_v61, %v1387_v62 }
 0x8e8   :  { %v1170_v0 = vpop.f32.mrf.mxu1 }
 0x8e9   :  { %v1171_v2 = vadd.f32 %v1387_v62, %v1170_v0  ;;  %v1183_v5 = vpack.c.bf16 %v1179_v63, %v1176_v3 }
 0x8eb   :  { %v1182_v4 = vpack.c.bf16 %v1171_v2, %v1168_v1 }
 0x8ed   :  { %1559 = vmatprep.mubr.msk.bf16.mxu0 %vm405_vm4, %v1182_v4 }
 0x8ee   :  { %1560 = vmatmul.mubr.msk.bf16.vlgmr.msra.gmra.mxu0 %vm405_vm4, %v1183_v5 }
 0x8ef   :  { %1564 = vmatpush3.bf16.msra.mxu0 %v1591_v6 }
 0x9ae   :  { %v1561_v7 = vpop.f32.mrf.mxu0 }
 0x9af   :  { %v1256_v13 = vadd.f32 %v1561_v7, %v1394_v9 }
 0x9b0   :  { %v1247_v8 = vpop.f32.mrf.mxu0 }
 0x9b1   :  { %v1248_v11 = vadd.f32 %v1394_v9, %v1247_v8  ;;  %v1264_v19 = vmax.f32 %v1256_v13, 0.0 }
 0x9b2   :  { %v1562_v10 = vpop.f32.mrf.mxu0 }
 0x9b3   :  { %v1259_v12 = vadd.f32 %v1562_v10, %v1394_v9  ;;  %v1262_v17 = vmax.f32 %v1248_v11, 0.0 }
 0x9b4   :  { %v1250_v14 = vpop.f32.mrf.mxu0 }
 0x9b5   :  { %v1251_v15 = vadd.f32 %v1394_v9, %v1250_v14  ;;  %v1265_v16 = vmax.f32 %v1259_v12, 0.0 }
 0x9b7   :  { %v1263_v18 = vmax.f32 %v1251_v15, 0.0  ;;  %v1267_v21 = vpack.c.bf16 %v1265_v16, %v1264_v19 }
 0x9b9   :  { %v1266_v20 = vpack.c.bf16 %v1263_v18, %v1262_v17 }
 0x9bb   :  { %1565 = vmatprep.mubr.msk.bf16.mxu0 %vm175_vm2, %v1266_v20 }
 0x9bc   :  { %1566 = vmatmul.mubr.msk.bf16.vlgmr.msra.gmra.mxu0 %vm175_vm2, %v1267_v21 }
 0xa7c   :  { %v1567_v23 = vpop.f32.mrf.mxu0 }
 0xa7d   :  { %v1332_v25 = vadd.f32 %v1567_v23, %v1399_v22 }
 0xa7e   :  { %v1323_v26 = vpop.f32.mrf.mxu0 }
 0xa7f   :  { %1341 = vst.msk [vmem:[%s1970_s24 + $0x10] sm:$0xff] %vm1338_vm6, %v1332_v25  ;;  %v1324_v27 = vadd.f32 %v1399_v22, %v1323_v26 }
 0xa80   :  { %v1568_v28 = vpop.f32.mrf.mxu0 }
 0xa81   :  { %1339 = vst.msk [vmem:[%s1970_s24] sm:$0xff] %vm1338_vm6, %v1324_v27  ;;  %v1335_v29 = vadd.f32 %v1568_v28, %v1399_v22 }
 0xa82   :  { %v1326_v30 = vpop.f32.mrf.mxu0 }
 0xa83   :  { %1342 = vst.msk [vmem:[%s1970_s24 + $0x18] sm:$0xff] %vm1338_vm6, %v1335_v29  ;;  %v1327_v31 = vadd.f32 %v1399_v22, %v1326_v30 }
 0xa85   :  { %1340 = vst.msk [vmem:[%s1970_s24 + $0x8] sm:$0xff] %vm1338_vm6, %v1327_v31 }

</bundles_post_ra>
